<compile_context>
chip_gen: v6e
topology: v6e:2x2x1
jax: 0.10.0
libtpu: 0.0.40
codegen_flags: <defaults>
</compile_context>

<pallas_src>
import jax
import jax.numpy as jnp
from jax.experimental import pallas as pl
from jax.experimental.pallas import tpu as pltpu


def _round_up(x, m):
    return (x + m - 1) // m * m


def _freq2mid_kernel(x_ref, w_ref, out_ref):
    # (rb, 352) @ (352, 88) -> (rb, 88), f32 accumulate on the MXU.
    out_ref[...] = jnp.dot(
        x_ref[...], w_ref[...], preferred_element_type=jnp.float32
    ).astype(out_ref.dtype)


def _choose_row_block(rows, row_block):
    # Keep >=4 grid steps when the problem allows: lets the "parallel" row axis
    # shard across v7x's 2 TensorCores with >=2 pipelined steps per core, and
    # amortizes the ~0.35us per-grid-step overhead for large row counts.
    rb = min(row_block, max(8, _round_up(pl.cdiv(rows, 4), 8)))
    rb = _round_up(rb, 8)
    return max(8, min(rb, _round_up(rows, 8)))


def freq2mid_mat(ts, wmat_t, *, row_block=512):
    """Pallas implementation of freq2midMAT.forward: (B, T, 352) -> (B, T, 88).

    `wmat_t` is the pre-transposed selection matrix (352, 88), built once at init.
    """
    B, T, F = ts.shape
    F2, M = wmat_t.shape
    assert F == F2

    rows = B * T
    x = ts.reshape(rows, F)  # collapse (B, T) into one row axis (free reshape)

    rb = _choose_row_block(rows, row_block)
    grid = (pl.cdiv(rows, rb),)  # ragged last block handled by Pallas masking

    out = pl.pallas_call(
        _freq2mid_kernel,
        out_shape=jax.ShapeDtypeStruct((rows, M), ts.dtype),
        grid=grid,
        in_specs=[
            pl.BlockSpec((rb, F), lambda i: (i, 0)),   # big row slab (full 352-wide K)
            pl.BlockSpec((F, M), lambda i: (0, 0)),    # resident RHS (constant block idx)
        ],
        out_specs=pl.BlockSpec((rb, M), lambda i: (i, 0)),  # exact 88-wide output
        compiler_params=pltpu.CompilerParams(
            dimension_semantics=("parallel",)),
        cost_estimate=pl.CostEstimate(
            flops=2 * rows * F * M,
            transcendentals=0,
            bytes_accessed=ts.dtype.itemsize * (rows * F + F * M + rows * M),
        ),
    )(x, wmat_t)

    return out.reshape(B, T, M)


def make_wmat():
    # freq2midMAT.__init__: wMat = zeros(88, 352); wMat[i, i*4 + 1] = 1
    rows = jnp.arange(88)
    cols = rows * 4 + 1
    return jnp.zeros((88, 352), jnp.float32).at[rows, cols].set(1.0)


def make_wmat_t(wmat):
    # Pre-transposed kernel operand (352, 88); built once at module init so the
    # per-call wrapper does no scatter/pad/transpose work.
    return jnp.asarray(wmat.T, dtype=jnp.float32)


def pitchnet_forward(xs):
    """PitchNet.forward semantics.

    PyTorch:
        h0 = self.make_hcfp(xs)   # cfpLayer.stft2hcfp
        y  = self.segT(h0)        # deeplabv3p.segT(timesteps=512, input_channel=12, out_class=1)
        y  = y.view(btcS, -1, 352)
        return (y, y)
    """
    # TODO(synk): cfpLayer.stft2hcfp definition was not provided with the module — cannot be reproduced.
    # TODO(synk): deeplabv3p.segT definition was not provided with the module — cannot be reproduced.
    # `xs` is therefore taken to already be the segT output in NCHW: (B, 1, T, 352).
    btcS = xs.shape[0]
    y = xs.reshape(btcS, -1, 352)  # y.view(btcS, -1, 352)
    return y, y


if __name__ == "__main__":
    key = jax.random.PRNGKey(0)
    B, T, F = 2, 512, 352  # segT(timesteps=512) -> T = 512 frames, F = 352 bins
    # segT-output-shaped input: NCHW with out_class = 1 channel.
    xs = jax.random.normal(key, (B, 1, T, F), dtype=jnp.float32)

    # Module-init-time parameters (built once, not per call).
    wmat = make_wmat()            # deterministic parameter from freq2midMAT.__init__
    wmat_t = make_wmat_t(wmat)    # pre-transposed kernel operand (352, 88)

    y, y2 = pitchnet_forward(xs)
    assert y.shape == (B, T, F) and y2.shape == (B, T, F)

    # Hot-path Pallas kernel: the provided freq2midMAT module applied to y.
    midi = freq2mid_mat(y, wmat_t)
    midi = jax.block_until_ready(midi)

    # Check against pure-JAX reference of freq2midMAT.forward semantics.
    ref = jnp.einsum("btf,mf->btm", y, wmat)
    assert midi.shape == (B, T, 88)
    assert jnp.allclose(midi, ref, atol=1e-5, rtol=1e-5)
    # Sparse selection matrix: output channel i must equal input bin i*4+1.
    assert jnp.allclose(midi, y[:, :, 1:352:4], atol=1e-5, rtol=1e-5)

    print("KERNEL_OK")
</pallas_src>

<mosaic_0001>
module attributes {stable_mosaic.version = 11 : i64} {
  func.func @_freq2mid_kernel(%arg0: i32, %arg1: memref<256x352xf32, #tpu.memory_space<vmem>>, %arg2: memref<352x88xf32, #tpu.memory_space<vmem>>, %arg3: memref<256x88xf32, #tpu.memory_space<vmem>>) attributes {dimension_semantics = [#tpu.dimension_semantics<parallel>], iteration_bounds = array<i64: 4>, scalar_prefetch = 0 : i64, scratch_operands = 0 : i64, tpu.core_type = #tpu.core_type<tc>, window_params = [{transform_indices = @transform_0, window_bounds = array<i64: 256, 352>}, {pipeline_mode = #tpu.pipeline_mode<synchronous>, transform_indices = @transform_1, window_bounds = array<i64: 352, 88>}, {transform_indices = @transform_2, window_bounds = array<i64: 256, 88>}]} {
    %c0 = arith.constant 0 : index
    %c0_0 = arith.constant 0 : index
    %0 = vector.load %arg1[%c0, %c0_0] : memref<256x352xf32, #tpu.memory_space<vmem>>, vector<256x352xf32>
    %c0_1 = arith.constant 0 : index
    %c0_2 = arith.constant 0 : index
    %1 = vector.load %arg2[%c0_1, %c0_2] : memref<352x88xf32, #tpu.memory_space<vmem>>, vector<352x88xf32>
    %cst = arith.constant dense<0.000000e+00> : vector<256x88xf32>
    %2 = tpu.matmul %0, %1, %cst {dimension_numbers = #tpu.dot_dimension_numbers<[1], [0], [0], [1], [0, 0, 1, 1], [], []>} : vector<256x352xf32>, vector<352x88xf32>, vector<256x88xf32> -> vector<256x88xf32>
    %c0_3 = arith.constant 0 : index
    %c0_4 = arith.constant 0 : index
    %3 = vector.load %arg3[%c0_3, %c0_4] : memref<256x88xf32, #tpu.memory_space<vmem>>, vector<256x88xf32>
    tpu.vector_store %arg3[%c0_3, %c0_4], %2 {strides = array<i32>} : memref<256x88xf32, #tpu.memory_space<vmem>>, vector<256x88xf32>,
    return
  }
  func.func @transform_0(%arg0: i32) -> (i32, i32) {
    %c0_i32 = arith.constant 0 : i32
    %c0_i32_0 = arith.constant 0 : i32
    return %arg0, %c0_i32 : i32, i32
  }
  func.func @transform_1(%arg0: i32) -> (i32, i32) {
    %c0_i32 = arith.constant 0 : i32
    %c0_i32_0 = arith.constant 0 : i32
    %c0_i32_1 = arith.constant 0 : i32
    return %c0_i32, %c0_i32_0 : i32, i32
  }
  func.func @transform_2(%arg0: i32) -> (i32, i32) {
    %c0_i32 = arith.constant 0 : i32
    %c0_i32_0 = arith.constant 0 : i32
    return %arg0, %c0_i32 : i32, i32
  }
}

</mosaic_0001>

<bundles_post_ra>
// kernel: tpu_custom_call.1
= control target key start
LH: loop header
LB: loop body
LE: loop exit
PB: predicated region body
PF: predicated region fallthrough
CT: control target
= control target key end

     0   :  { %s1183_s9 = smov 0   ;;  %s1622_s0 = inlined_call_operand.vmem [shape: f32[1024,352], index: 0, kind: input, shape index: {}]   ;;  %s1623_s1 = inlined_call_operand.vmem [shape: f32[352,88], index: 1, kind: input, shape index: {}]   ;;  %s1624_s2 = inlined_call_operand.vmem [shape: f32[1024,88], index: 2, kind: output, shape index: {}]  }
   0x1 LB: > { %s926_s10 = sadd.s32 4294967295, %s1165_s9   ;;  %p930_p0 = scmp.ge.s32.totalorder %s1165_s9, 1  ;;  %s1165_s9 = sphi %s1183_s9, %s12_s9  }
   0x2   : > { %p114_p1 = scmp.lt.s32.totalorder %s1165_s9, 5 }
   0x4   : > { %p115_p2 = pnand %p930_p0, %p114_p1 }
   0x5   : > { %s931_s3 = sshll.u32 (!%p115_p2), %s926_s10, 5 }
   0x6   : > { %118 = sbr.rel (%p115_p2) target bundleno = 367 (0x16f), region = 28  ;;  %p138_p3 = scmp.lt.s32.totalorder (!%p115_p2), %s931_s3, 127 }
   0xb   : > { %v261_v0 = vld [vmem:[%s1623_s1 + $0x78] sm:$0xff]  ;;  %v1167_v1 = vmov 0.0   ;;  %v260_v2 = vld [vmem:[%s1623_s1 + $0x70] sm:$0xff]  ;;  %v259_v3 = vld [vmem:[%s1623_s1 + $0x68] sm:$0xff]  ;;  %s1626_s3 = smov (!%p138_p3, %s931_s3), 127  ;;  %vm290_vm0 = vcmask 785408  }
   0xc   : > { %387 = vmatprep.subr.mxu0 %v1167_v1  ;;  %1085 = vmatprep.subr.mxu1 %v1167_v1  ;;  %v258_v4 = vld [vmem:[%s1623_s1 + $0x60] sm:$0xff]  ;;  %v257_v5 = vld [vmem:[%s1623_s1 + $0x58] sm:$0xff]  ;;  %v256_v6 = vld [vmem:[%s1623_s1 + $0x50] sm:$0xff]  ;;  %s1149_s17 = smul.u32 24, %s1626_s3  ;;  %vm837_vm1 = vcmask 719872  }
   0xd   : > { %388 = vmatpush1.msra.mxu0 %v261_v0  ;;  %1117 = vmatpush1.msra.mxu1 %v261_v0  ;;  %v255_v7 = vld [vmem:[%s1623_s1 + $0x48] sm:$0xff]  ;;  %v254_v8 = vld [vmem:[%s1623_s1 + $0x40] sm:$0xff]  ;;  %v253_v9 = vld [vmem:[%s1623_s1 + $0x38] sm:$0xff] }
   0xe   : > { %389 = vmatprep.subr.mxu0 %v1167_v1  ;;  %1086 = vmatprep.subr.mxu1 %v1167_v1  ;;  %v252_v10 = vld [vmem:[%s1623_s1 + $0x30] sm:$0xff]  ;;  %v251_v11 = vld [vmem:[%s1623_s1 + $0x28] sm:$0xff]  ;;  %v250_v12 = vld [vmem:[%s1623_s1 + $0x20] sm:$0xff]  ;;  %s1352_s24 = scalar_lea.vmem %s1622_s0, %s1149_s17 }
   0xf   : > { %390 = vmatpush1.msra.mxu0 %v260_v2  ;;  %1118 = vmatpush1.msra.mxu1 %v260_v2  ;;  %v249_v13 = vld [vmem:[%s1623_s1 + $0x18] sm:$0xff]  ;;  %v248_v14 = vld [vmem:[%s1623_s1 + $0x10] sm:$0xff]  ;;  %v247_v15 = vld [vmem:[%s1623_s1 + $0x8] sm:$0xff] }
  0x10   : > { %391 = vmatprep.subr.mxu0 %v1167_v1  ;;  %1087 = vmatprep.subr.mxu1 %v1167_v1  ;;  %v246_v16 = vld [vmem:[%s1623_s1] sm:$0xff]  ;;  %v277_v17 = vld [vmem:[%s1623_s1 + $0xf8] sm:$0xff]  ;;  %v276_v18 = vld [vmem:[%s1623_s1 + $0xf0] sm:$0xff] }
  0x11   : > { %392 = vmatpush1.msra.mxu0 %v259_v3  ;;  %1119 = vmatpush1.msra.mxu1 %v259_v3  ;;  %v275_v19 = vld [vmem:[%s1623_s1 + $0xe8] sm:$0xff]  ;;  %v274_v20 = vld [vmem:[%s1623_s1 + $0xe0] sm:$0xff]  ;;  %v273_v21 = vld [vmem:[%s1623_s1 + $0xd8] sm:$0xff] }
  0x12   : > { %393 = vmatprep.subr.mxu0 %v1167_v1  ;;  %1088 = vmatprep.subr.mxu1 %v1167_v1  ;;  %v272_v22 = vld [vmem:[%s1623_s1 + $0xd0] sm:$0xff]  ;;  %v271_v23 = vld [vmem:[%s1623_s1 + $0xc8] sm:$0xff]  ;;  %v270_v24 = vld [vmem:[%s1623_s1 + $0xc0] sm:$0xff] }
  0x13   : > { %394 = vmatpush1.msra.mxu0 %v258_v4  ;;  %1120 = vmatpush1.msra.mxu1 %v258_v4  ;;  %v269_v25 = vld [vmem:[%s1623_s1 + $0xb8] sm:$0xff]  ;;  %v268_v26 = vld [vmem:[%s1623_s1 + $0xb0] sm:$0xff]  ;;  %v267_v27 = vld [vmem:[%s1623_s1 + $0xa8] sm:$0xff] }
  0x14   : > { %395 = vmatprep.subr.mxu0 %v1167_v1  ;;  %1089 = vmatprep.subr.mxu1 %v1167_v1  ;;  %v266_v28 = vld [vmem:[%s1623_s1 + $0xa0] sm:$0xff]  ;;  %v265_v29 = vld [vmem:[%s1623_s1 + $0x98] sm:$0xff]  ;;  %v264_v30 = vld [vmem:[%s1623_s1 + $0x90] sm:$0xff] }
  0x15   : > { %396 = vmatpush1.msra.mxu0 %v257_v5  ;;  %1121 = vmatpush1.msra.mxu1 %v257_v5  ;;  %v263_v31 = vld [vmem:[%s1623_s1 + $0x88] sm:$0xff]  ;;  %v262_v32 = vld [vmem:[%s1623_s1 + $0x80] sm:$0xff]  ;;  %v289_v37 = vld [vmem:[%s1623_s1 + $0x158] sm:$0xff] }
  0x16   : > { %397 = vmatprep.subr.mxu0 %v1167_v1  ;;  %1090 = vmatprep.subr.mxu1 %v1167_v1  ;;  %v151_v33 = vld [vmem:[%s1352_s24 + $0x8] sm:$0xff]  ;;  %v150_v35 = vld [vmem:[%s1352_s24] sm:$0xff]  ;;  %v288_v40 = vld [vmem:[%s1623_s1 + $0x150] sm:$0xff] }
  0x17   : > { %398 = vmatpush1.msra.mxu0 %v256_v6  ;;  %1122 = vmatpush1.msra.mxu1 %v256_v6  ;;  %v223_v34 = vld [vmem:[%s1352_s24 + $0x248] sm:$0xff]  ;;  %v222_v36 = vld [vmem:[%s1352_s24 + $0x240] sm:$0xff]  ;;  %v153_v41 = vld [vmem:[%s1352_s24 + $0x18] sm:$0xff] }
  0x18   : > { %399 = vmatprep.subr.mxu0 %v1167_v1  ;;  %1091 = vmatprep.subr.mxu1 %v1167_v1  ;;  %v154_v38 = vld [vmem:[%s1352_s24 + $0x20] sm:$0xff]  ;;  %v225_v42 = vld [vmem:[%s1352_s24 + $0x258] sm:$0xff]  ;;  %v287_v44 = vld [vmem:[%s1623_s1 + $0x148] sm:$0xff] }
  0x19   : > { %400 = vmatpush1.msra.mxu0 %v255_v7  ;;  %1123 = vmatpush1.msra.mxu1 %v255_v7  ;;  %v226_v39 = vld [vmem:[%s1352_s24 + $0x260] sm:$0xff]  ;;  %v157_v43 = vld [vmem:[%s1352_s24 + $0x38] sm:$0xff]  ;;  %v156_v46 = vld [vmem:[%s1352_s24 + $0x30] sm:$0xff] }
  0x1a   : > { %401 = vmatprep.subr.mxu0 %v1167_v1  ;;  %1092 = vmatprep.subr.mxu1 %v1167_v1  ;;  %v229_v45 = vld [vmem:[%s1352_s24 + $0x278] sm:$0xff]  ;;  %v228_v47 = vld [vmem:[%s1352_s24 + $0x270] sm:$0xff]  ;;  %v286_v48 = vld [vmem:[%s1623_s1 + $0x140] sm:$0xff] }
  0x1b   : > { %402 = vmatpush1.msra.mxu0 %v254_v8  ;;  %1124 = vmatpush1.msra.mxu1 %v254_v8  ;;  %v160_v49 = vld [vmem:[%s1352_s24 + $0x50] sm:$0xff]  ;;  %v285_v51 = vld [vmem:[%s1623_s1 + $0x138] sm:$0xff]  ;;  %v159_v52 = vld [vmem:[%s1352_s24 + $0x48] sm:$0xff] }
  0x1c   : > { %403 = vmatprep.subr.mxu0 %v1167_v1  ;;  %1093 = vmatprep.subr.mxu1 %v1167_v1  ;;  %v232_v50 = vld [vmem:[%s1352_s24 + $0x290] sm:$0xff]  ;;  %v231_v53 = vld [vmem:[%s1352_s24 + $0x288] sm:$0xff]  ;;  %v162_v57 = vld [vmem:[%s1352_s24 + $0x60] sm:$0xff] }
  0x1d   : > { %404 = vmatpush1.msra.mxu0 %v253_v9  ;;  %1125 = vmatpush1.msra.mxu1 %v253_v9  ;;  %v163_v54 = vld [vmem:[%s1352_s24 + $0x68] sm:$0xff]  ;;  %v284_v55 = vld [vmem:[%s1623_s1 + $0x130] sm:$0xff]  ;;  %v234_v58 = vld [vmem:[%s1352_s24 + $0x2a0] sm:$0xff] }
  0x1e   : > { %405 = vmatprep.subr.mxu0 %v1167_v1  ;;  %1094 = vmatprep.subr.mxu1 %v1167_v1  ;;  %v235_v56 = vld [vmem:[%s1352_s24 + $0x2a8] sm:$0xff]  ;;  %v166_v60 = vld [vmem:[%s1352_s24 + $0x80] sm:$0xff]  ;;  %v165_v63 = vld [vmem:[%s1352_s24 + $0x78] sm:$0xff] }
  0x1f   : > { %406 = vmatpush1.msra.mxu0 %v252_v10  ;;  %1126 = vmatpush1.msra.mxu1 %v252_v10  ;;  %v283_v59 = vld [vmem:[%s1623_s1 + $0x128] sm:$0xff]  ;;  %v238_v61 = vld [vmem:[%s1352_s24 + $0x2c0] sm:$0xff]  ;;  %v237_v0 = vld [vmem:[%s1352_s24 + $0x2b8] sm:$0xff] }
  0x20   : > { %407 = vmatprep.subr.mxu0 %v1167_v1  ;;  %1095 = vmatprep.subr.mxu1 %v1167_v1  ;;  %v282_v62 = vld [vmem:[%s1623_s1 + $0x120] sm:$0xff]  ;;  %v281_v2 = vld [vmem:[%s1623_s1 + $0x118] sm:$0xff]  ;;  %v168_v4 = vld [vmem:[%s1352_s24 + $0x90] sm:$0xff] }
  0x21   : > { %408 = vmatpush1.msra.mxu0 %v251_v11  ;;  %1127 = vmatpush1.msra.mxu1 %v251_v11  ;;  %v241_v3 = vld [vmem:[%s1352_s24 + $0x2d8] sm:$0xff]  ;;  %v240_v5 = vld [vmem:[%s1352_s24 + $0x2d0] sm:$0xff]  ;;  %v279_v9 = vld [vmem:[%s1623_s1 + $0x108] sm:$0xff] }
  0x22   : > { %409 = vmatprep.subr.mxu0 %v1167_v1  ;;  %1096 = vmatprep.subr.mxu1 %v1167_v1  ;;  %v280_v6 = vld [vmem:[%s1623_s1 + $0x110] sm:$0xff]  ;;  %v171_v10 = vld [vmem:[%s1352_s24 + $0xa8] sm:$0xff] }
  0x23   : > { %410 = vmatpush1.msra.mxu0 %v250_v12  ;;  %1128 = vmatpush1.msra.mxu1 %v250_v12  ;;  %v172_v7 = vld [vmem:[%s1352_s24 + $0xb0] sm:$0xff]  ;;  %v243_v11 = vld [vmem:[%s1352_s24 + $0x2e8] sm:$0xff] }
  0x24   : > { %411 = vmatprep.subr.mxu0 %v1167_v1  ;;  %1097 = vmatprep.subr.mxu1 %v1167_v1  ;;  %v244_v8 = vld [vmem:[%s1352_s24 + $0x2f0] sm:$0xff]  ;;  %v175_v12 = vld [vmem:[%s1352_s24 + $0xc8] sm:$0xff] }
  0x25   : > { %412 = vmatpush1.msra.mxu0 %v249_v13  ;;  %1129 = vmatpush1.msra.mxu1 %v249_v13  ;;  %v278_v13 = vld [vmem:[%s1623_s1 + $0x100] sm:$0xff] }
  0x26   : > { %413 = vmatprep.subr.mxu0 %v1167_v1  ;;  %1098 = vmatprep.subr.mxu1 %v1167_v1 }
  0x27   : > { %414 = vmatpush1.msra.mxu0 %v248_v14  ;;  %1130 = vmatpush1.msra.mxu1 %v248_v14  ;;  %v152_v14 = vld [vmem:[%s1352_s24 + $0x10] sm:$0xff] }
  0x28   : > { %415 = vmatprep.subr.mxu0 %v1167_v1  ;;  %1099 = vmatprep.subr.mxu1 %v1167_v1 }
  0x29   : > { %416 = vmatpush1.msra.mxu0 %v247_v15  ;;  %1131 = vmatpush1.msra.mxu1 %v247_v15  ;;  %v174_v15 = vld [vmem:[%s1352_s24 + $0xc0] sm:$0xff] }
  0x2a   : > { %417 = vmatprep.subr.mxu0 %v1167_v1  ;;  %1100 = vmatprep.subr.mxu1 %v1167_v1 }
  0x2b   : > { %418 = vmatpush1.msra.mxu0 %v246_v16  ;;  %1132 = vmatpush1.msra.mxu1 %v246_v16  ;;  %v155_v16 = vld [vmem:[%s1352_s24 + $0x28] sm:$0xff] }
  0x2c   : > { %419 = vmatprep.subr.mxu0 %v1167_v1  ;;  %1101 = vmatprep.subr.mxu1 %v1167_v1 }
  0x2d   : > { %420 = vmatpush2.msra.mxu0 %v277_v17  ;;  %1133 = vmatpush2.msra.mxu1 %v277_v17  ;;  %v178_v17 = vld [vmem:[%s1352_s24 + $0xe0] sm:$0xff] }
  0x2e   : > { %421 = vmatprep.subr.mxu0 %v1167_v1  ;;  %1102 = vmatprep.subr.mxu1 %v1167_v1 }
  0x2f   : > { %422 = vmatpush2.msra.mxu0 %v276_v18  ;;  %1134 = vmatpush2.msra.mxu1 %v276_v18  ;;  %v158_v18 = vld [vmem:[%s1352_s24 + $0x40] sm:$0xff] }
  0x30   : > { %423 = vmatprep.subr.mxu0 %v1167_v1  ;;  %1103 = vmatprep.subr.mxu1 %v1167_v1 }
  0x31   : > { %424 = vmatpush2.msra.mxu0 %v275_v19  ;;  %1135 = vmatpush2.msra.mxu1 %v275_v19  ;;  %v177_v19 = vld [vmem:[%s1352_s24 + $0xd8] sm:$0xff] }
  0x32   : > { %425 = vmatprep.subr.mxu0 %v1167_v1  ;;  %1104 = vmatprep.subr.mxu1 %v1167_v1 }
  0x33   : > { %426 = vmatpush2.msra.mxu0 %v274_v20  ;;  %1136 = vmatpush2.msra.mxu1 %v274_v20  ;;  %v161_v20 = vld [vmem:[%s1352_s24 + $0x58] sm:$0xff] }
  0x34   : > { %427 = vmatprep.subr.mxu0 %v1167_v1  ;;  %1105 = vmatprep.subr.mxu1 %v1167_v1 }
  0x35   : > { %428 = vmatpush2.msra.mxu0 %v273_v21  ;;  %1137 = vmatpush2.msra.mxu1 %v273_v21  ;;  %v181_v21 = vld [vmem:[%s1352_s24 + $0xf8] sm:$0xff] }
  0x36   : > { %429 = vmatprep.subr.mxu0 %v1167_v1  ;;  %1106 = vmatprep.subr.mxu1 %v1167_v1 }
  0x37   : > { %430 = vmatpush2.msra.mxu0 %v272_v22  ;;  %1138 = vmatpush2.msra.mxu1 %v272_v22  ;;  %v164_v22 = vld [vmem:[%s1352_s24 + $0x70] sm:$0xff] }
  0x38   : > { %431 = vmatprep.subr.mxu0 %v1167_v1  ;;  %1107 = vmatprep.subr.mxu1 %v1167_v1 }
  0x39   : > { %432 = vmatpush2.msra.mxu0 %v271_v23  ;;  %1139 = vmatpush2.msra.mxu1 %v271_v23  ;;  %v180_v23 = vld [vmem:[%s1352_s24 + $0xf0] sm:$0xff] }
  0x3a   : > { %433 = vmatprep.subr.mxu0 %v1167_v1  ;;  %1108 = vmatprep.subr.mxu1 %v1167_v1 }
  0x3b   : > { %434 = vmatpush2.msra.mxu0 %v270_v24  ;;  %1140 = vmatpush2.msra.mxu1 %v270_v24  ;;  %v167_v24 = vld [vmem:[%s1352_s24 + $0x88] sm:$0xff] }
  0x3c   : > { %435 = vmatprep.subr.mxu0 %v1167_v1  ;;  %1109 = vmatprep.subr.mxu1 %v1167_v1 }
  0x3d   : > { %436 = vmatpush2.msra.mxu0 %v269_v25  ;;  %1141 = vmatpush2.msra.mxu1 %v269_v25  ;;  %v184_v25 = vld [vmem:[%s1352_s24 + $0x110] sm:$0xff] }
  0x3e   : > { %437 = vmatprep.subr.mxu0 %v1167_v1  ;;  %1110 = vmatprep.subr.mxu1 %v1167_v1 }
  0x3f   : > { %438 = vmatpush2.msra.mxu0 %v268_v26  ;;  %1142 = vmatpush2.msra.mxu1 %v268_v26  ;;  %v170_v26 = vld [vmem:[%s1352_s24 + $0xa0] sm:$0xff] }
  0x40   : > { %439 = vmatprep.subr.mxu0 %v1167_v1  ;;  %1111 = vmatprep.subr.mxu1 %v1167_v1 }
  0x41   : > { %440 = vmatpush2.msra.mxu0 %v267_v27  ;;  %1143 = vmatpush2.msra.mxu1 %v267_v27  ;;  %v183_v27 = vld [vmem:[%s1352_s24 + $0x108] sm:$0xff] }
  0x42   : > { %441 = vmatprep.subr.mxu0 %v1167_v1  ;;  %1112 = vmatprep.subr.mxu1 %v1167_v1 }
  0x43   : > { %442 = vmatpush2.msra.mxu0 %v266_v28  ;;  %1144 = vmatpush2.msra.mxu1 %v266_v28  ;;  %v173_v28 = vld [vmem:[%s1352_s24 + $0xb8] sm:$0xff] }
  0x44   : > { %443 = vmatprep.subr.mxu0 %v1167_v1  ;;  %1113 = vmatprep.subr.mxu1 %v1167_v1 }
  0x45   : > { %444 = vmatpush2.msra.mxu0 %v265_v29  ;;  %1145 = vmatpush2.msra.mxu1 %v265_v29  ;;  %v187_v29 = vld [vmem:[%s1352_s24 + $0x128] sm:$0xff] }
  0x46   : > { %445 = vmatprep.subr.mxu0 %v1167_v1  ;;  %1114 = vmatprep.subr.mxu1 %v1167_v1 }
  0x47   : > { %446 = vmatpush2.msra.mxu0 %v264_v30  ;;  %1146 = vmatpush2.msra.mxu1 %v264_v30  ;;  %v176_v30 = vld [vmem:[%s1352_s24 + $0xd0] sm:$0xff] }
  0x48   : > { %447 = vmatprep.subr.mxu0 %v1167_v1  ;;  %1115 = vmatprep.subr.mxu1 %v1167_v1 }
  0x49   : > { %448 = vmatpush2.msra.mxu0 %v263_v31  ;;  %1147 = vmatpush2.msra.mxu1 %v263_v31  ;;  %v186_v31 = vld [vmem:[%s1352_s24 + $0x120] sm:$0xff] }
  0x4a   : > { %449 = vmatprep.subr.mxu0 %v1167_v1  ;;  %1116 = vmatprep.subr.mxu1 %v1167_v1  ;;  %v169_v1 = vld [vmem:[%s1352_s24 + $0x98] sm:$0xff] }
  0x4b   : > { %450 = vmatpush2.msra.mxu0 %v262_v32  ;;  %1148 = vmatpush2.msra.mxu1 %v262_v32  ;;  %v179_v32 = vld [vmem:[%s1352_s24 + $0xe8] sm:$0xff] }
  0x4c   : > { %451 = vmatprep.mubr.f32.mxu0 %v151_v33  ;;  %571 = vmatprep.mubr.f32.mxu1 %v223_v34  ;;  %v190_v33 = vld [vmem:[%s1352_s24 + $0x140] sm:$0xff] }
  0x4d   : > { %452 = vmatmul.mubr.f32.vlgmr.msra.gmra.mxu0 %v150_v35  ;;  %572 = vmatmul.mubr.f32.vlgmr.msra.gmra.mxu1 %v222_v36  ;;  %v182_v34 = vld [vmem:[%s1352_s24 + $0x100] sm:$0xff]  ;;  %v189_v35 = vld [vmem:[%s1352_s24 + $0x138] sm:$0xff] }
  0x4e   : > { %1013 = vmatprep.subr.mxu1 %v289_v37  ;;  %456 = vmatprep.mubr.f32.mxu0 %v154_v38  ;;  %v185_v36 = vld [vmem:[%s1352_s24 + $0x118] sm:$0xff]  ;;  %v188_v38 = vld [vmem:[%s1352_s24 + $0x130] sm:$0xff] }
  0x4f   : > { %1014 = vmatpush3.msra.mxu1 %v289_v37  ;;  %576 = vmatprep.mubr.f32.mxu1 %v226_v39  ;;  %v193_v37 = vld [vmem:[%s1352_s24 + $0x158] sm:$0xff]  ;;  %v192_v39 = vld [vmem:[%s1352_s24 + $0x150] sm:$0xff] }
  0x50   : > { %1015 = vmatprep.subr.mxu1 %v288_v40 }
  0x51   : > { %457 = vmatmul.mubr.f32.gmra.mxu0 %v153_v41  ;;  %577 = vmatmul.mubr.f32.gmra.mxu1 %v225_v42  ;;  %v196_v41 = vld [vmem:[%s1352_s24 + $0x170] sm:$0xff]  ;;  %v194_v42 = vld [vmem:[%s1352_s24 + $0x160] sm:$0xff] }
  0x52   : > { %1016 = vmatpush3.msra.mxu1 %v288_v40  ;;  %461 = vmatprep.mubr.f32.mxu0 %v157_v43  ;;  %v191_v40 = vld [vmem:[%s1352_s24 + $0x148] sm:$0xff] }
  0x53   : > { %1017 = vmatprep.subr.mxu1 %v287_v44  ;;  %581 = vmatprep.mubr.f32.mxu1 %v229_v45  ;;  %v195_v43 = vld [vmem:[%s1352_s24 + $0x168] sm:$0xff] }
  0x54   : > { %1018 = vmatpush3.msra.mxu1 %v287_v44  ;;  %v197_v44 = vld [vmem:[%s1352_s24 + $0x178] sm:$0xff]  ;;  %v199_v45 = vld [vmem:[%s1352_s24 + $0x188] sm:$0xff] }
  0x55   : > { %462 = vmatmul.mubr.f32.gmra.mxu0 %v156_v46  ;;  %582 = vmatmul.mubr.f32.gmra.mxu1 %v228_v47  ;;  %v200_v46 = vld [vmem:[%s1352_s24 + $0x190] sm:$0xff]  ;;  %v198_v47 = vld [vmem:[%s1352_s24 + $0x180] sm:$0xff] }
  0x56   : > { %1019 = vmatprep.subr.mxu1 %v286_v48  ;;  %466 = vmatprep.mubr.f32.mxu0 %v160_v49  ;;  %v202_v49 = vld [vmem:[%s1352_s24 + $0x1a0] sm:$0xff] }
  0x57   : > { %1020 = vmatpush3.msra.mxu1 %v286_v48  ;;  %586 = vmatprep.mubr.f32.mxu1 %v232_v50  ;;  %v203_v48 = vld [vmem:[%s1352_s24 + $0x1a8] sm:$0xff]  ;;  %v206_v50 = vld [vmem:[%s1352_s24 + $0x1c0] sm:$0xff] }
  0x58   : > { %1021 = vmatprep.subr.mxu1 %v285_v51 }
  0x59   : > { %467 = vmatmul.mubr.f32.gmra.mxu0 %v159_v52  ;;  %587 = vmatmul.mubr.f32.gmra.mxu1 %v231_v53  ;;  %v209_v52 = vld [vmem:[%s1352_s24 + $0x1d8] sm:$0xff] }
  0x5a   : > { %1022 = vmatpush3.msra.mxu1 %v285_v51  ;;  %471 = vmatprep.mubr.f32.mxu0 %v163_v54  ;;  %v201_v51 = vld [vmem:[%s1352_s24 + $0x198] sm:$0xff]  ;;  %v212_v54 = vld [vmem:[%s1352_s24 + $0x1f0] sm:$0xff] }
  0x5b   : > { %1023 = vmatprep.subr.mxu1 %v284_v55  ;;  %591 = vmatprep.mubr.f32.mxu1 %v235_v56  ;;  %v205_v53 = vld [vmem:[%s1352_s24 + $0x1b8] sm:$0xff]  ;;  %v215_v56 = vld [vmem:[%s1352_s24 + $0x208] sm:$0xff] }
  0x5c   : > { %1024 = vmatpush3.msra.mxu1 %v284_v55  ;;  %v204_v55 = vld [vmem:[%s1352_s24 + $0x1b0] sm:$0xff] }
  0x5d   : > { %472 = vmatmul.mubr.f32.gmra.mxu0 %v162_v57  ;;  %592 = vmatmul.mubr.f32.gmra.mxu1 %v234_v58  ;;  %v208_v57 = vld [vmem:[%s1352_s24 + $0x1d0] sm:$0xff]  ;;  %v218_v58 = vld [vmem:[%s1352_s24 + $0x220] sm:$0xff] }
  0x5e   : > { %1025 = vmatprep.subr.mxu1 %v283_v59  ;;  %476 = vmatprep.mubr.f32.mxu0 %v166_v60  ;;  %v221_v60 = vld [vmem:[%s1352_s24 + $0x238] sm:$0xff] }
  0x5f   : > { %1026 = vmatpush3.msra.mxu1 %v283_v59  ;;  %596 = vmatprep.mubr.f32.mxu1 %v238_v61  ;;  %v207_v59 = vld [vmem:[%s1352_s24 + $0x1c8] sm:$0xff] }
  0x60   : > { %1027 = vmatprep.subr.mxu1 %v282_v62  ;;  %v211_v61 = vld [vmem:[%s1352_s24 + $0x1e8] sm:$0xff] }
  0x61   : > { %477 = vmatmul.mubr.f32.gmra.mxu0 %v165_v63  ;;  %597 = vmatmul.mubr.f32.gmra.mxu1 %v237_v0  ;;  %v210_v63 = vld [vmem:[%s1352_s24 + $0x1e0] sm:$0xff]  ;;  %v227_v0 = vld [vmem:[%s1352_s24 + $0x268] sm:$0xff] }
  0x62   : > { %1028 = vmatpush3.msra.mxu1 %v282_v62  ;;  %481 = vmatprep.mubr.f32.mxu0 %v169_v1  ;;  %v224_v62 = vld [vmem:[%s1352_s24 + $0x250] sm:$0xff]  ;;  %v214_v1 = vld [vmem:[%s1352_s24 + $0x200] sm:$0xff] }
  0x63   : > { %1029 = vmatprep.subr.mxu1 %v281_v2  ;;  %601 = vmatprep.mubr.f32.mxu1 %v241_v3  ;;  %v213_v3 = vld [vmem:[%s1352_s24 + $0x1f8] sm:$0xff] }
  0x64   : > { %1030 = vmatpush3.msra.mxu1 %v281_v2  ;;  %v230_v2 = vld [vmem:[%s1352_s24 + $0x280] sm:$0xff] }
  0x65   : > { %482 = vmatmul.mubr.f32.gmra.mxu0 %v168_v4  ;;  %602 = vmatmul.mubr.f32.gmra.mxu1 %v240_v5  ;;  %v233_v4 = vld [vmem:[%s1352_s24 + $0x298] sm:$0xff] }
  0x66   : > { %1031 = vmatprep.subr.mxu1 %v280_v6  ;;  %486 = vmatprep.mubr.f32.mxu0 %v172_v7  ;;  %v217_v5 = vld [vmem:[%s1352_s24 + $0x218] sm:$0xff]  ;;  %v216_v7 = vld [vmem:[%s1352_s24 + $0x210] sm:$0xff] }
  0x67   : > { %1032 = vmatpush3.msra.mxu1 %v280_v6  ;;  %606 = vmatprep.mubr.f32.mxu1 %v244_v8  ;;  %v236_v6 = vld [vmem:[%s1352_s24 + $0x2b0] sm:$0xff]  ;;  %v239_v8 = vld [vmem:[%s1352_s24 + $0x2c8] sm:$0xff] }
  0x68   : > { %1033 = vmatprep.subr.mxu1 %v279_v9 }
  0x69   : > { %487 = vmatmul.mubr.f32.gmra.mxu0 %v171_v10  ;;  %607 = vmatmul.mubr.f32.gmra.mxu1 %v243_v11  ;;  %v242_v10 = vld [vmem:[%s1352_s24 + $0x2e0] sm:$0xff]  ;;  %v219_v11 = vld [vmem:[%s1352_s24 + $0x228] sm:$0xff] }
  0x6a   : > { %1034 = vmatpush3.msra.mxu1 %v279_v9  ;;  %491 = vmatprep.mubr.f32.mxu0 %v175_v12  ;;  %v220_v9 = vld [vmem:[%s1352_s24 + $0x230] sm:$0xff]  ;;  %v245_v12 = vld [vmem:[%s1352_s24 + $0x2f8] sm:$0xff]  ;;  %s934_s24 = sshll.u32 %s1626_s3, 3 }
  0x6b   : > { %1035 = vmatprep.subr.mxu1 %v278_v13  ;;  %1037 = vmatprep.mubr.msk.f32.mxu1 %vm290_vm0, %v152_v14  ;;  %s1545_s28 = scalar_lea.vmem %s1624_s2, %s934_s24 }
  0x6c   : > { %1036 = vmatpush3.msra.mxu1 %v278_v13 }
  0x6d   : > { %492 = vmatmul.mubr.f32.gmra.mxu0 %v174_v15  ;;  %1038 = vmatmul.mubr.msk.f32.vlgmr.msra.gmra.mxu1 %vm290_vm0, %v155_v16 }
  0x6e   : > { %496 = vmatprep.mubr.f32.mxu0 %v178_v17  ;;  %1040 = vmatprep.mubr.msk.f32.mxu1 %vm290_vm0, %v158_v18 }
  0x71   : > { %497 = vmatmul.mubr.f32.gmra.mxu0 %v177_v19  ;;  %1041 = vmatmul.mubr.msk.f32.gmra.mxu1 %vm290_vm0, %v161_v20 }
  0x72   : > { %501 = vmatprep.mubr.f32.mxu0 %v181_v21  ;;  %1043 = vmatprep.mubr.msk.f32.mxu1 %vm290_vm0, %v164_v22 }
  0x75   : > { %502 = vmatmul.mubr.f32.gmra.mxu0 %v180_v23  ;;  %1044 = vmatmul.mubr.msk.f32.gmra.mxu1 %vm290_vm0, %v167_v24 }
  0x76   : > { %506 = vmatprep.mubr.f32.mxu0 %v184_v25  ;;  %1046 = vmatprep.mubr.msk.f32.mxu1 %vm290_vm0, %v170_v26 }
  0x79   : > { %507 = vmatmul.mubr.f32.gmra.mxu0 %v183_v27  ;;  %1047 = vmatmul.mubr.msk.f32.gmra.mxu1 %vm290_vm0, %v173_v28 }
  0x7a   : > { %511 = vmatprep.mubr.f32.mxu0 %v187_v29  ;;  %1049 = vmatprep.mubr.msk.f32.mxu1 %vm290_vm0, %v176_v30 }
  0x7d   : > { %512 = vmatmul.mubr.f32.gmra.mxu0 %v186_v31  ;;  %1050 = vmatmul.mubr.msk.f32.gmra.mxu1 %vm290_vm0, %v179_v32 }
  0x7e   : > { %516 = vmatprep.mubr.f32.mxu0 %v190_v33  ;;  %1052 = vmatprep.mubr.msk.f32.mxu1 %vm290_vm0, %v182_v34 }
  0x81   : > { %517 = vmatmul.mubr.f32.gmra.mxu0 %v189_v35  ;;  %1053 = vmatmul.mubr.msk.f32.gmra.mxu1 %vm290_vm0, %v185_v36 }
  0x82   : > { %521 = vmatprep.mubr.f32.mxu0 %v193_v37  ;;  %1055 = vmatprep.mubr.msk.f32.mxu1 %vm290_vm0, %v188_v38 }
  0x85   : > { %522 = vmatmul.mubr.f32.gmra.mxu0 %v192_v39  ;;  %1056 = vmatmul.mubr.msk.f32.gmra.mxu1 %vm290_vm0, %v191_v40 }
  0x86   : > { %526 = vmatprep.mubr.f32.mxu0 %v196_v41  ;;  %1058 = vmatprep.mubr.msk.f32.mxu1 %vm290_vm0, %v194_v42 }
  0x89   : > { %527 = vmatmul.mubr.f32.gmra.mxu0 %v195_v43  ;;  %1059 = vmatmul.mubr.msk.f32.gmra.mxu1 %vm290_vm0, %v197_v44 }
  0x8a   : > { %531 = vmatprep.mubr.f32.mxu0 %v199_v45  ;;  %1061 = vmatprep.mubr.msk.f32.mxu1 %vm290_vm0, %v200_v46 }
  0x8d   : > { %532 = vmatmul.mubr.f32.gmra.mxu0 %v198_v47  ;;  %1062 = vmatmul.mubr.msk.f32.gmra.mxu1 %vm290_vm0, %v203_v48 }
  0x8e   : > { %536 = vmatprep.mubr.f32.mxu0 %v202_v49  ;;  %1064 = vmatprep.mubr.msk.f32.mxu1 %vm290_vm0, %v206_v50 }
  0x91   : > { %537 = vmatmul.mubr.f32.gmra.mxu0 %v201_v51  ;;  %1065 = vmatmul.mubr.msk.f32.gmra.mxu1 %vm290_vm0, %v209_v52 }
  0x92   : > { %541 = vmatprep.mubr.f32.mxu0 %v205_v53  ;;  %1067 = vmatprep.mubr.msk.f32.mxu1 %vm290_vm0, %v212_v54 }
  0x95   : > { %542 = vmatmul.mubr.f32.gmra.mxu0 %v204_v55  ;;  %1068 = vmatmul.mubr.msk.f32.gmra.mxu1 %vm290_vm0, %v215_v56 }
  0x96   : > { %546 = vmatprep.mubr.f32.mxu0 %v208_v57  ;;  %1070 = vmatprep.mubr.msk.f32.mxu1 %vm290_vm0, %v218_v58 }
  0x99   : > { %547 = vmatmul.mubr.f32.gmra.mxu0 %v207_v59  ;;  %1071 = vmatmul.mubr.msk.f32.gmra.mxu1 %vm290_vm0, %v221_v60 }
  0x9a   : > { %551 = vmatprep.mubr.f32.mxu0 %v211_v61  ;;  %1073 = vmatprep.mubr.msk.f32.mxu1 %vm290_vm0, %v224_v62 }
  0x9d   : > { %552 = vmatmul.mubr.f32.gmra.mxu0 %v210_v63  ;;  %1074 = vmatmul.mubr.msk.f32.gmra.mxu1 %vm290_vm0, %v227_v0 }
  0x9e   : > { %556 = vmatprep.mubr.f32.mxu0 %v214_v1  ;;  %1076 = vmatprep.mubr.msk.f32.mxu1 %vm290_vm0, %v230_v2 }
  0xa1   : > { %557 = vmatmul.mubr.f32.gmra.mxu0 %v213_v3  ;;  %1077 = vmatmul.mubr.msk.f32.gmra.mxu1 %vm290_vm0, %v233_v4 }
  0xa2   : > { %561 = vmatprep.mubr.f32.mxu0 %v217_v5  ;;  %1079 = vmatprep.mubr.msk.f32.mxu1 %vm290_vm0, %v236_v6 }
  0xa5   : > { %562 = vmatmul.mubr.f32.gmra.mxu0 %v216_v7  ;;  %1080 = vmatmul.mubr.msk.f32.gmra.mxu1 %vm290_vm0, %v239_v8 }
  0xa6   : > { %566 = vmatprep.mubr.f32.mxu0 %v220_v9  ;;  %1082 = vmatprep.mubr.msk.f32.mxu1 %vm290_vm0, %v242_v10 }
  0xa9   : > { %567 = vmatmul.mubr.f32.gmra.mxu0 %v219_v11  ;;  %1083 = vmatmul.mubr.msk.f32.gmra.mxu1 %vm290_vm0, %v245_v12 }
 0x10d   : > { %v453_v13 = vpop.f32.mrf.mxu0  ;;  %v1525_v14 = vpop.f32.mrf.mxu1 }
 0x10f   : > { %v455_v15 = vpop.f32.mrf.mxu0  ;;  %v575_v16 = vpop.f32.mrf.mxu1 }
 0x111   : > { %v458_v17 = vpop.f32.mrf.mxu0  ;;  %v1527_v18 = vpop.f32.mrf.mxu1 }
 0x113   : > { %v460_v19 = vpop.f32.mrf.mxu0  ;;  %v580_v20 = vpop.f32.mrf.mxu1 }
 0x115   : > { %v463_v21 = vpop.f32.mrf.mxu0  ;;  %v1529_v22 = vpop.f32.mrf.mxu1 }
 0x117   : > { %v465_v23 = vpop.f32.mrf.mxu0  ;;  %v585_v24 = vpop.f32.mrf.mxu1 }
 0x119   : > { %v468_v25 = vpop.f32.mrf.mxu0  ;;  %v1531_v26 = vpop.f32.mrf.mxu1 }
 0x11b   : > { %v470_v27 = vpop.f32.mrf.mxu0  ;;  %v590_v28 = vpop.f32.mrf.mxu1 }
 0x11d   : > { %v473_v29 = vpop.f32.mrf.mxu0  ;;  %v1533_v30 = vpop.f32.mrf.mxu1 }
 0x11f   : > { %v475_v31 = vpop.f32.mrf.mxu0  ;;  %v595_v32 = vpop.f32.mrf.mxu1 }
 0x121   : > { %v478_v33 = vpop.f32.mrf.mxu0  ;;  %v1535_v34 = vpop.f32.mrf.mxu1 }
 0x123   : > { %v480_v35 = vpop.f32.mrf.mxu0  ;;  %v600_v36 = vpop.f32.mrf.mxu1 }
 0x125   : > { %v483_v37 = vpop.f32.mrf.mxu0  ;;  %v1537_v38 = vpop.f32.mrf.mxu1 }
 0x127   : > { %v485_v39 = vpop.f32.mrf.mxu0  ;;  %v605_v40 = vpop.f32.mrf.mxu1 }
 0x129   : > { %v488_v41 = vpop.f32.mrf.mxu0  ;;  %v1539_v42 = vpop.f32.mrf.mxu1 }
 0x12b   : > { %v490_v43 = vpop.f32.mrf.mxu0  ;;  %v610_v44 = vpop.f32.mrf.mxu1 }
 0x12d   : > { %v493_v45 = vpop.f32.mrf.mxu0  ;;  %v1039_v46 = vpop.f32.mrf.mxu1 }
 0x12e   : > { %v684_v47 = vadd.f32 %v1039_v46, %v458_v17 }
 0x12f   : > { %v495_v48 = vpop.f32.mrf.mxu0  ;;  %v678_v49 = vpop.f32.mrf.mxu1 }
 0x130   : > { %839 = vst.msk [vmem:[%s1545_s28 + $0x8] sm:$0xff] %vm837_vm1, %v684_v47  ;;  %v679_v50 = vadd.f32 %v678_v49, %v453_v13 }
 0x131   : > { %v498_v51 = vpop.f32.mrf.mxu0  ;;  %v1042_v52 = vpop.f32.mrf.mxu1 }
 0x132   : > { %838 = vst.msk [vmem:[%s1545_s28] sm:$0xff] %vm837_vm1, %v679_v50  ;;  %v694_v53 = vadd.f32 %v1042_v52, %v468_v25 }
 0x133   : > { %v500_v54 = vpop.f32.mrf.mxu0  ;;  %v688_v55 = vpop.f32.mrf.mxu1 }
 0x134   : > { %841 = vst.msk [vmem:[%s1545_s28 + $0x18] sm:$0xff] %vm837_vm1, %v694_v53  ;;  %v689_v56 = vadd.f32 %v688_v55, %v463_v21 }
 0x135   : > { %v503_v57 = vpop.f32.mrf.mxu0  ;;  %v1045_v58 = vpop.f32.mrf.mxu1 }
 0x136   : > { %840 = vst.msk [vmem:[%s1545_s28 + $0x10] sm:$0xff] %vm837_vm1, %v689_v56  ;;  %v704_v59 = vadd.f32 %v1045_v58, %v478_v33 }
 0x137   : > { %v505_v60 = vpop.f32.mrf.mxu0  ;;  %v698_v61 = vpop.f32.mrf.mxu1 }
 0x138   : > { %843 = vst.msk [vmem:[%s1545_s28 + $0x28] sm:$0xff] %vm837_vm1, %v704_v59  ;;  %v699_v62 = vadd.f32 %v698_v61, %v473_v29 }
 0x139   : > { %v508_v63 = vpop.f32.mrf.mxu0  ;;  %v1048_v0 = vpop.f32.mrf.mxu1 }
 0x13a   : > { %842 = vst.msk [vmem:[%s1545_s28 + $0x20] sm:$0xff] %vm837_vm1, %v699_v62  ;;  %v714_v1 = vadd.f32 %v1048_v0, %v488_v41 }
 0x13b   : > { %v510_v2 = vpop.f32.mrf.mxu0  ;;  %v708_v3 = vpop.f32.mrf.mxu1 }
 0x13c   : > { %845 = vst.msk [vmem:[%s1545_s28 + $0x38] sm:$0xff] %vm837_vm1, %v714_v1  ;;  %v709_v4 = vadd.f32 %v708_v3, %v483_v37 }
 0x13d   : > { %v513_v5 = vpop.f32.mrf.mxu0  ;;  %v1051_v6 = vpop.f32.mrf.mxu1 }
 0x13e   : > { %844 = vst.msk [vmem:[%s1545_s28 + $0x30] sm:$0xff] %vm837_vm1, %v709_v4  ;;  %v724_v7 = vadd.f32 %v1051_v6, %v498_v51 }
 0x13f   : > { %v515_v8 = vpop.f32.mrf.mxu0  ;;  %v718_v9 = vpop.f32.mrf.mxu1 }
 0x140   : > { %847 = vst.msk [vmem:[%s1545_s28 + $0x48] sm:$0xff] %vm837_vm1, %v724_v7  ;;  %v719_v10 = vadd.f32 %v718_v9, %v493_v45 }
 0x141   : > { %v518_v11 = vpop.f32.mrf.mxu0  ;;  %v1054_v12 = vpop.f32.mrf.mxu1 }
 0x142   : > { %846 = vst.msk [vmem:[%s1545_s28 + $0x40] sm:$0xff] %vm837_vm1, %v719_v10  ;;  %v734_v13 = vadd.f32 %v1054_v12, %v508_v63 }
 0x143   : > { %v520_v15 = vpop.f32.mrf.mxu0  ;;  %v728_v16 = vpop.f32.mrf.mxu1 }
 0x144   : > { %849 = vst.msk [vmem:[%s1545_s28 + $0x58] sm:$0xff] %vm837_vm1, %v734_v13  ;;  %v729_v17 = vadd.f32 %v728_v16, %v503_v57 }
 0x145   : > { %v523_v19 = vpop.f32.mrf.mxu0  ;;  %v1057_v20 = vpop.f32.mrf.mxu1 }
 0x146   : > { %848 = vst.msk [vmem:[%s1545_s28 + $0x50] sm:$0xff] %vm837_vm1, %v729_v17  ;;  %v744_v21 = vadd.f32 %v1057_v20, %v518_v11 }
 0x147   : > { %v525_v23 = vpop.f32.mrf.mxu0  ;;  %v738_v24 = vpop.f32.mrf.mxu1 }
 0x148   : > { %851 = vst.msk [vmem:[%s1545_s28 + $0x68] sm:$0xff] %vm837_vm1, %v744_v21  ;;  %v739_v25 = vadd.f32 %v738_v24, %v513_v5 }
 0x149   : > { %v528_v27 = vpop.f32.mrf.mxu0  ;;  %v1060_v28 = vpop.f32.mrf.mxu1 }
 0x14a   : > { %850 = vst.msk [vmem:[%s1545_s28 + $0x60] sm:$0xff] %vm837_vm1, %v739_v25  ;;  %v754_v29 = vadd.f32 %v1060_v28, %v528_v27 }
 0x14b   : > { %v530_v31 = vpop.f32.mrf.mxu0  ;;  %v748_v32 = vpop.f32.mrf.mxu1 }
 0x14c   : > { %853 = vst.msk [vmem:[%s1545_s28 + $0x78] sm:$0xff] %vm837_vm1, %v754_v29  ;;  %v749_v33 = vadd.f32 %v748_v32, %v523_v19 }
 0x14d   : > { %v533_v35 = vpop.f32.mrf.mxu0  ;;  %v1063_v36 = vpop.f32.mrf.mxu1 }
 0x14e   : > { %852 = vst.msk [vmem:[%s1545_s28 + $0x70] sm:$0xff] %vm837_vm1, %v749_v33 }
 0x14f   : > { %v535_v37 = vpop.f32.mrf.mxu0  ;;  %v758_v39 = vpop.f32.mrf.mxu1 }
 0x150   : > { %v759_v40 = vadd.f32 %v758_v39, %v533_v35 }
 0x151   : > { %v538_v41 = vpop.f32.mrf.mxu0  ;;  %v1066_v43 = vpop.f32.mrf.mxu1 }
 0x152   : > { %854 = vst.msk [vmem:[%s1545_s28 + $0x80] sm:$0xff] %vm837_vm1, %v759_v40  ;;  %v764_v44 = vadd.f32 %v1063_v36, %v538_v41 }
 0x153   : > { %v540_v45 = vpop.f32.mrf.mxu0  ;;  %v768_v46 = vpop.f32.mrf.mxu1 }
 0x154   : > { %855 = vst.msk [vmem:[%s1545_s28 + $0x88] sm:$0xff] %vm837_vm1, %v764_v44 }
 0x155   : > { %v543_v47 = vpop.f32.mrf.mxu0  ;;  %v1069_v48 = vpop.f32.mrf.mxu1 }
 0x156   : > { %v769_v49 = vadd.f32 %v768_v46, %v543_v47 }
 0x157   : > { %v545_v50 = vpop.f32.mrf.mxu0  ;;  %v778_v51 = vpop.f32.mrf.mxu1 }
 0x158   : > { %856 = vst.msk [vmem:[%s1545_s28 + $0x90] sm:$0xff] %vm837_vm1, %v769_v49 }
 0x159   : > { %v548_v52 = vpop.f32.mrf.mxu0  ;;  %v1072_v53 = vpop.f32.mrf.mxu1 }
 0x15a   : > { %v774_v54 = vadd.f32 %v1066_v43, %v548_v52 }
 0x15b   : > { %v550_v55 = vpop.f32.mrf.mxu0  ;;  %v788_v56 = vpop.f32.mrf.mxu1 }
 0x15c   : > { %857 = vst.msk [vmem:[%s1545_s28 + $0x98] sm:$0xff] %vm837_vm1, %v774_v54 }
 0x15d   : > { %v553_v57 = vpop.f32.mrf.mxu0  ;;  %v1075_v58 = vpop.f32.mrf.mxu1 }
 0x15e   : > { %v779_v59 = vadd.f32 %v778_v51, %v553_v57  ;;  %v804_v60 = vadd.f32 %v1075_v58, %v1527_v18 }
 0x15f   : > { %v555_v61 = vpop.f32.mrf.mxu0  ;;  %v798_v62 = vpop.f32.mrf.mxu1 }
 0x160   : > { %858 = vst.msk [vmem:[%s1545_s28 + $0xa0] sm:$0xff] %vm837_vm1, %v779_v59  ;;  %863 = vst.msk [vmem:[%s1545_s28 + $0xc8] sm:$0xff] %vm837_vm1, %v804_v60  ;;  %v799_v63 = vadd.f32 %v798_v62, %v1525_v14 }
 0x161   : > { %v558_v0 = vpop.f32.mrf.mxu0  ;;  %v1078_v1 = vpop.f32.mrf.mxu1 }
 0x162   : > { %862 = vst.msk [vmem:[%s1545_s28 + $0xc0] sm:$0xff] %vm837_vm1, %v799_v63  ;;  %v784_v2 = vadd.f32 %v1069_v48, %v558_v0  ;;  %v814_v3 = vadd.f32 %v1078_v1, %v1531_v26 }
 0x163   : > { %v560_v4 = vpop.f32.mrf.mxu0  ;;  %v808_v18 = vpop.f32.mrf.mxu1 }
 0x164   : > { %859 = vst.msk [vmem:[%s1545_s28 + $0xa8] sm:$0xff] %vm837_vm1, %v784_v2  ;;  %865 = vst.msk [vmem:[%s1545_s28 + $0xd8] sm:$0xff] %vm837_vm1, %v814_v3  ;;  %v809_v5 = vadd.f32 %v808_v18, %v1529_v22 }
 0x165   : > { %v563_v6 = vpop.f32.mrf.mxu0  ;;  %v1081_v14 = vpop.f32.mrf.mxu1 }
 0x166   : > { %864 = vst.msk [vmem:[%s1545_s28 + $0xd0] sm:$0xff] %vm837_vm1, %v809_v5  ;;  %v789_v7 = vadd.f32 %v788_v56, %v563_v6  ;;  %v824_v8 = vadd.f32 %v1081_v14, %v1535_v34 }
 0x167   : > { %v565_v26 = vpop.f32.mrf.mxu0  ;;  %v818_v9 = vpop.f32.mrf.mxu1 }
 0x168   : > { %860 = vst.msk [vmem:[%s1545_s28 + $0xb0] sm:$0xff] %vm837_vm1, %v789_v7  ;;  %867 = vst.msk [vmem:[%s1545_s28 + $0xe8] sm:$0xff] %vm837_vm1, %v824_v8  ;;  %v819_v10 = vadd.f32 %v818_v9, %v1533_v30 }
 0x169   : > { %v568_v11 = vpop.f32.mrf.mxu0  ;;  %v1084_v22 = vpop.f32.mrf.mxu1 }
 0x16a   : > { %866 = vst.msk [vmem:[%s1545_s28 + $0xe0] sm:$0xff] %vm837_vm1, %v819_v10  ;;  %v794_v12 = vadd.f32 %v1072_v53, %v568_v11  ;;  %v834_v13 = vadd.f32 %v1084_v22, %v1539_v42 }
 0x16b   : > { %v828_v15 = vpop.f32.mrf.mxu1  ;;  %v570_v16 = vpop.f32.mrf.mxu0 }
 0x16c   : > { %861 = vst.msk [vmem:[%s1545_s28 + $0xb8] sm:$0xff] %vm837_vm1, %v794_v12  ;;  %869 = vst.msk [vmem:[%s1545_s28 + $0xf8] sm:$0xff] %vm837_vm1, %v834_v13  ;;  %v829_v34 = vadd.f32 %v828_v15, %v1537_v38 }
 0x16e   : > { %868 = vst.msk [vmem:[%s1545_s28 + $0xf0] sm:$0xff] %vm837_vm1, %v829_v34 }
 0x16f PF: > { %s12_s9 = sadd.s32 1, %s1165_s9  }
 0x170   : > { %p9_p4 = scmp.ge.s32.totalorder %s12_s9, 6  }
 0x172   :  { %11 = sbr.rel (!%p9_p4) target bundleno = 1 (0x1), region = 58 }

</bundles_post_ra>
